<compile_context>
chip_gen: v5e
topology: v5e:2x2
jax: 0.10.0
libtpu: 0.0.40
codegen_flags: <defaults>
</compile_context>

<pallas_src>
import numpy as np
import jax
import jax.numpy as jnp
from jax.experimental import pallas as pl
from jax.experimental.pallas import tpu as pltpu

# ---------------------------------------------------------------------------
# db3 decomposition filters (pywt convention) -- deterministic constants.
# ---------------------------------------------------------------------------
_DB3_DEC_LO = np.array(
    [0.035226291882100656, -0.08544127388224149, -0.13501102001039084,
     0.4598775021193313, 0.8068915093133388, 0.3326705529509569],
    dtype=np.float64)
_L = len(_DB3_DEC_LO)
_DB3_DEC_HI = np.array(
    [((-1.0) ** (k + 1)) * _DB3_DEC_LO[_L - 1 - k] for k in range(_L)],
    dtype=np.float64)


def _afb_matrices_trimmed(N):
    """Stride-2 analysis filter-bank matrices with 'zero' padding folded in.

    Matches pytorch_wavelets.lowlevel.afb1d(mode='zero'):
      outsize = floor((N + L - 1) / 2)          (pywt.dwt_coeff_len, zero)
      p       = 2*(outsize-1) - N + L           (total padding)
      out[k]  = sum_m x_pad[2k + m] * h_rev[m]  (cross-corr of reversed filter)
    Since the padding is zeros, we build the full (outsize, N+p) banded matrix
    and slice columns [pad_l : pad_l+N] so the matrices act on the UNPADDED
    signal directly.  Returns (A_lo, A_hi, outsize) with A_* of shape
    (outsize, N), float32.
    """
    L = _L
    outsize = (N + L - 1) // 2
    p = 2 * (outsize - 1) - N + L
    pad_l = p // 2
    n_pad = N + p
    h_lo_rev = _DB3_DEC_LO[::-1]
    h_hi_rev = _DB3_DEC_HI[::-1]
    A_lo = np.zeros((outsize, n_pad), dtype=np.float64)
    A_hi = np.zeros((outsize, n_pad), dtype=np.float64)
    for k in range(outsize):
        A_lo[k, 2 * k:2 * k + L] = h_lo_rev
        A_hi[k, 2 * k:2 * k + L] = h_hi_rev
    # Fold zero padding: keep only columns that touch real samples.
    A_lo = A_lo[:, pad_l:pad_l + N]
    A_hi = A_hi[:, pad_l:pad_l + N]
    return A_lo.astype(np.float32), A_hi.astype(np.float32), outsize


def _pick_tb(bc, H, W, Ho, Wo):
    """Images per grid step, sized so double-buffered in+out blocks stay well
    under the default scoped VMEM limit on all of v5e/v6e/v7x."""
    budget = 12 << 20                                   # bytes for in+out bufs
    per_img = 4 * (H * W + 4 * Ho * Wo)                 # f32 in + fused out
    tb = max(1, budget // max(2 * per_img, 1))          # x2: double buffering
    return int(min(tb, bc, 64))


# ---------------------------------------------------------------------------
# Pallas kernel: one DWT level for a block of TB (batch*channel) images.
# ---------------------------------------------------------------------------
def _dwt_level_kernel(x_ref, ac_ref, art_ref, y_ref):
    TB, H, W = x_ref.shape
    two_ho = ac_ref.shape[0]
    two_wo = art_ref.shape[1]

    x = x_ref[...]                 # (TB, H, W) unpadded images
    ac = ac_ref[...]               # (2*Ho, H)  fused column (height) filters
    art = art_ref[...]             # (W, 2*Wo)  fused row (width) filters, transposed

    # Row (width) pass.
    if H % 8 == 0:
        # One MXU-filling matmul on the flattened slab.
        t = jnp.dot(x.reshape(TB * H, W), art,
                    preferred_element_type=jnp.float32).reshape(TB, H, two_wo)
    else:
        # H not sublane-aligned: avoid the reshape, use a batched matmul.
        art_b = jnp.broadcast_to(art, (TB, W, two_wo))
        t = jnp.einsum('bhw,bwp->bhp', x, art_b,
                       preferred_element_type=jnp.float32)

    # Column (height) pass -- batched matmul, all four sub-bands at once.
    ac_b = jnp.broadcast_to(ac, (TB, two_ho, H))
    y_ref[...] = jnp.einsum('boh,bhw->bow', ac_b, t,
                            preferred_element_type=jnp.float32)


def _dwt_level(x, H, W):
    """One analysis level.  x: (BC, H, W) float32 -> (ll, yh, H_out, W_out)."""
    Ac_lo, Ac_hi, Ho = _afb_matrices_trimmed(H)
    Ar_lo, Ar_hi, Wo = _afb_matrices_trimmed(W)
    ac = jnp.asarray(np.concatenate([Ac_lo, Ac_hi], axis=0))       # (2Ho, H)
    art = jnp.asarray(np.concatenate([Ar_lo.T, Ar_hi.T], axis=1))  # (W, 2Wo)

    bc = x.shape[0]
    tb = _pick_tb(bc, H, W, Ho, Wo)
    n_blocks = -(-bc // tb)
    bc_pad = n_blocks * tb
    if bc_pad != bc:
        x = jnp.pad(x, ((0, bc_pad - bc), (0, 0), (0, 0)))

    flops = 2 * bc_pad * (H * W * (2 * Wo) + H * (2 * Wo) * (2 * Ho))
    bytes_accessed = 4 * (bc_pad * H * W + 2 * Ho * H + W * 2 * Wo
                          + bc_pad * 4 * Ho * Wo)

    y = pl.pallas_call(
        _dwt_level_kernel,
        out_shape=jax.ShapeDtypeStruct((bc_pad, 2 * Ho, 2 * Wo), jnp.float32),
        grid=(n_blocks,),
        in_specs=[
            pl.BlockSpec((tb, H, W), lambda i: (i, 0, 0)),
            pl.BlockSpec((2 * Ho, H), lambda i: (0, 0)),
            pl.BlockSpec((W, 2 * Wo), lambda i: (0, 0)),
        ],
        out_specs=pl.BlockSpec((tb, 2 * Ho, 2 * Wo), lambda i: (i, 0, 0)),
        compiler_params=pltpu.CompilerParams(
            dimension_semantics=("parallel",)),
        cost_estimate=pl.CostEstimate(
            flops=int(flops), transcendentals=0,
            bytes_accessed=int(bytes_accessed)),
    )(x, ac, art)

    y = y[:bc]
    # Quadrants: rows [:Ho] = col-lowpass, [Ho:] = col-highpass;
    #            cols [:Wo] = row-lowpass, [Wo:] = row-highpass.
    ll = y[:, :Ho, :Wo]
    lh = y[:, Ho:, :Wo]     # row-lo, col-hi
    hl = y[:, :Ho, Wo:]     # row-hi, col-lo
    hh = y[:, Ho:, Wo:]     # row-hi, col-hi
    yh = jnp.stack([lh, hl, hh], axis=1)   # [LH, HL, HH] as in pytorch_wavelets
    return ll, yh, Ho, Wo


def wavelet_transform_forward(x, J=3):
    """Forward of Wavelet_Transform (DWT branch): returns (Yl, Yh[0], ..., Yh[J-1]).

    x: (B, C, H, W) float32 (NCHW, as in PyTorch).
    Yl: (B, C, Hj, Wj);  Yh[i]: (B, C, 3, Hi, Wi)  -- same as pytorch_wavelets.
    """
    B, C, H, W = x.shape
    ll = x.reshape(B * C, H, W).astype(jnp.float32)
    outputs_h = []
    h, w = H, W
    for _ in range(J):
        ll, yh, h, w = _dwt_level(ll, h, w)
        outputs_h.append(yh.reshape(B, C, 3, h, w))
    Yl = ll.reshape(B, C, h, w)
    return (Yl,) + tuple(outputs_h)


# ---------------------------------------------------------------------------
# Pure-numpy reference (explicit zero-pad + separate lo/hi filters).
# ---------------------------------------------------------------------------
def _ref_forward(x_np, J):
    B, C, H, W = x_np.shape
    ll = x_np.reshape(B * C, H, W).astype(np.float64)
    outs = []
    h, w = H, W
    L = _L
    lo_rev = _DB3_DEC_LO[::-1]
    hi_rev = _DB3_DEC_HI[::-1]

    def afb_full(N):
        outsize = (N + L - 1) // 2
        p = 2 * (outsize - 1) - N + L
        pad_l, pad_r = p // 2, p - p // 2
        A_lo = np.zeros((outsize, N + p))
        A_hi = np.zeros((outsize, N + p))
        for k in range(outsize):
            A_lo[k, 2 * k:2 * k + L] = lo_rev
            A_hi[k, 2 * k:2 * k + L] = hi_rev
        return A_lo, A_hi, pad_l, pad_r, outsize

    for _ in range(J):
        Ac_lo, Ac_hi, ph_l, ph_r, Ho = afb_full(h)
        Ar_lo, Ar_hi, pw_l, pw_r, Wo = afb_full(w)
        xp = np.pad(ll, ((0, 0), (ph_l, ph_r), (pw_l, pw_r)))
        t_lo = xp @ Ar_lo.T
        t_hi = xp @ Ar_hi.T
        new_ll = np.einsum('oh,bhw->bow', Ac_lo, t_lo)
        lh = np.einsum('oh,bhw->bow', Ac_hi, t_lo)
        hl = np.einsum('oh,bhw->bow', Ac_lo, t_hi)
        hh = np.einsum('oh,bhw->bow', Ac_hi, t_hi)
        outs.append(np.stack([lh, hl, hh], axis=1).reshape(B, C, 3, Ho, Wo))
        ll, h, w = new_ll, Ho, Wo
    return (ll.reshape(B, C, h, w),) + tuple(outs)


if __name__ == "__main__":
    B, C, H, W = 2, 4, 16, 16
    J = 3
    key = jax.random.PRNGKey(0)
    x = jax.random.normal(key, (B, C, H, W), dtype=jnp.float32)

    outs = wavelet_transform_forward(x, J=J)
    outs = jax.block_until_ready(outs)

    refs = _ref_forward(np.asarray(x), J)
    assert len(outs) == J + 1
    for got, ref in zip(outs, refs):
        assert got.shape == ref.shape, (got.shape, ref.shape)
        np.testing.assert_allclose(np.asarray(got), ref, rtol=1e-4, atol=1e-4)

    print("KERNEL_OK")
</pallas_src>

<mosaic_0001>
module attributes {stable_mosaic.version = 11 : i64} {
  func.func @_dwt_level_kernel(%arg0: i32, %arg1: memref<8x16x16xf32, #tpu.memory_space<vmem>>, %arg2: memref<20x16xf32, #tpu.memory_space<vmem>>, %arg3: memref<16x20xf32, #tpu.memory_space<vmem>>, %arg4: memref<8x20x20xf32, #tpu.memory_space<vmem>>) attributes {dimension_semantics = [#tpu.dimension_semantics<parallel>], iteration_bounds = array<i64: 1>, scalar_prefetch = 0 : i64, scratch_operands = 0 : i64, tpu.core_type = #tpu.core_type<tc>, window_params = [{transform_indices = @transform_0, window_bounds = array<i64: 8, 16, 16>}, {pipeline_mode = #tpu.pipeline_mode<synchronous>, transform_indices = @transform_1, window_bounds = array<i64: 20, 16>}, {pipeline_mode = #tpu.pipeline_mode<synchronous>, transform_indices = @transform_2, window_bounds = array<i64: 16, 20>}, {transform_indices = @transform_3, window_bounds = array<i64: 8, 20, 20>}]} {
    %c0 = arith.constant 0 : index
    %c0_0 = arith.constant 0 : index
    %c0_1 = arith.constant 0 : index
    %0 = vector.load %arg1[%c0, %c0_0, %c0_1] : memref<8x16x16xf32, #tpu.memory_space<vmem>>, vector<8x16x16xf32>
    %c0_2 = arith.constant 0 : index
    %c0_3 = arith.constant 0 : index
    %1 = vector.load %arg2[%c0_2, %c0_3] : memref<20x16xf32, #tpu.memory_space<vmem>>, vector<20x16xf32>
    %c0_4 = arith.constant 0 : index
    %c0_5 = arith.constant 0 : index
    %2 = vector.load %arg3[%c0_4, %c0_5] : memref<16x20xf32, #tpu.memory_space<vmem>>, vector<16x20xf32>
    %3 = vector.shape_cast %0 : vector<8x16x16xf32> to vector<128x16xf32>
    %cst = arith.constant dense<0.000000e+00> : vector<128x20xf32>
    %4 = tpu.matmul %3, %2, %cst {dimension_numbers = #tpu.dot_dimension_numbers<[1], [0], [0], [1], [0, 0, 1, 1], [], []>} : vector<128x16xf32>, vector<16x20xf32>, vector<128x20xf32> -> vector<128x20xf32>
    %5 = vector.shape_cast %4 : vector<128x20xf32> to vector<8x16x20xf32>
    %6 = vector.shape_cast %1 : vector<20x16xf32> to vector<1x20x16xf32>
    %7 = vector.broadcast %6 : vector<1x20x16xf32> to vector<8x20x16xf32>
    "tpu.trace_start"() <{level = 10 : i32, message = "boh,bhw->bow"}> : () -> ()
    %cst_6 = arith.constant dense<0.000000e+00> : vector<8x20x20xf32>
    %8 = tpu.matmul %7, %5, %cst_6 {dimension_numbers = #tpu.dot_dimension_numbers<[2], [1], [1], [2], [0, 0, 0, 1, 1, 2], [0], [0]>} : vector<8x20x16xf32>, vector<8x16x20xf32>, vector<8x20x20xf32> -> vector<8x20x20xf32>
    "tpu.trace_stop"() : () -> ()
    %c0_7 = arith.constant 0 : index
    %c0_8 = arith.constant 0 : index
    %c0_9 = arith.constant 0 : index
    %9 = vector.load %arg4[%c0_7, %c0_8, %c0_9] : memref<8x20x20xf32, #tpu.memory_space<vmem>>, vector<8x20x20xf32>
    tpu.vector_store %arg4[%c0_7, %c0_8, %c0_9], %8 {strides = array<i32>} : memref<8x20x20xf32, #tpu.memory_space<vmem>>, vector<8x20x20xf32>,
    return
  }
  func.func @transform_0(%arg0: i32) -> (i32, i32, i32) {
    %c0_i32 = arith.constant 0 : i32
    %c0_i32_0 = arith.constant 0 : i32
    %c0_i32_1 = arith.constant 0 : i32
    return %arg0, %c0_i32, %c0_i32_0 : i32, i32, i32
  }
  func.func @transform_1(%arg0: i32) -> (i32, i32) {
    %c0_i32 = arith.constant 0 : i32
    %c0_i32_0 = arith.constant 0 : i32
    %c0_i32_1 = arith.constant 0 : i32
    return %c0_i32, %c0_i32_0 : i32, i32
  }
  func.func @transform_2(%arg0: i32) -> (i32, i32) {
    %c0_i32 = arith.constant 0 : i32
    %c0_i32_0 = arith.constant 0 : i32
    %c0_i32_1 = arith.constant 0 : i32
    return %c0_i32, %c0_i32_0 : i32, i32
  }
  func.func @transform_3(%arg0: i32) -> (i32, i32, i32) {
    %c0_i32 = arith.constant 0 : i32
    %c0_i32_0 = arith.constant 0 : i32
    %c0_i32_1 = arith.constant 0 : i32
    return %arg0, %c0_i32, %c0_i32_0 : i32, i32, i32
  }
}

</mosaic_0001>

<bundles_post_ra>
// kernel: tpu_custom_call.1
= control target key start
LH: loop header
LB: loop body
LE: loop exit
PB: predicated region body
PF: predicated region fallthrough
CT: control target
= control target key end

     0   :  { %8 = vsyncpa [#allocation3], 0  ;;  %s488_s15 = smov [#allocation2]   ;;  %s489_s17 = smov 128   ;;  %s665_s0 = inlined_call_operand.hbm [shape: f32[8,16,16], index: 0, kind: input, shape index: {}]   ;;  %s666_s1 = inlined_call_operand.vmem [shape: f32[20,16], index: 1, kind: input, shape index: {}]   ;;  %s667_s2 = inlined_call_operand.vmem [shape: f32[16,20], index: 2, kind: input, shape index: {}]   ;;  %s668_s3 = inlined_call_operand.vmem [shape: f32[8,20,20], index: 3, kind: output, shape index: {}]  }
   0x1   :  { %s13_s14 = sshll.u32 %s665_s0, 4  ;;  %s15_s16 = sshll.u32 %s488_s15, 4  ;;  %s14_s14 = int_to_ptr.hbm [resolvable:$true] %s13_s14  ;;  %s16_s16 = int_to_ptr.vmem [resolvable:$true] %s15_s16 }
   0x2   :  { %s490_s18 = smov 8  }
   0x3   :  { %21 = dma.hbm_to_vmem [thread:$0]  %s14_s14, 2048, %s16_s16, [#allocation3], %s489_s17, %s489_s17, %s490_s18  }
   0x4   :  { %486 = dma.done.wait [#allocation3], 2048  }
   0x5   :  { %487 = vsyncadd [#allocation3], 4294965248  ;;  %v50_v0 = vld [vmem:[%s667_s2 + $0x8] sm:$0xff]  ;;  %v49_v1 = vld [vmem:[%s667_s2] sm:$0xff]  ;;  %vm51_vm0 = vcmask 130048   ;;  %vm382_vm1 = vcmask 162816  }
   0x6   :  { %114 = vmatpush.msra.mxu0 %v50_v0  ;;  %v30_v2 = vld [vmem:[#allocation2] sm:$0xff]  ;;  %455 = vmatpush.msra.mxu3 %v50_v0  ;;  %v31_v3 = vld [vmem:[#allocation2 + $0x8] sm:$0xff]  ;;  %v32_v4 = vld [vmem:[#allocation2 + $0x10] sm:$0xff]  ;;  %vm385_vm2 = vcmask 158720  }
   0x7   :  { %454 = vmatpush.msra.mxu2 %v50_v0  ;;  %453 = vmatpush.msra.mxu1 %v50_v0  ;;  %v33_v5 = vld [vmem:[#allocation2 + $0x18] sm:$0xff]  ;;  %v42_v6 = vld [vmem:[#allocation2 + $0x60] sm:$0xff]  ;;  %v43_v8 = vld [vmem:[#allocation2 + $0x68] sm:$0xff] }
   0x8   :  { %115 = vmatpush.msra.mxu0 %v49_v1  ;;  %458 = vmatpush.msra.mxu3 %v49_v1  ;;  %v34_v7 = vld [vmem:[#allocation2 + $0x20] sm:$0xff]  ;;  %v35_v9 = vld [vmem:[#allocation2 + $0x28] sm:$0xff]  ;;  %v44_v10 = vld [vmem:[#allocation2 + $0x70] sm:$0xff] }
   0x9   :  { %413 = vmatmul.msk.f32.vlgmr.msra.gmra.mxu0 %vm51_vm0, %v30_v2  ;;  %457 = vmatpush.msra.mxu2 %v49_v1  ;;  %v41_v11 = vld [vmem:[#allocation2 + $0x58] sm:$0xff]  ;;  %v40_v12 = vld [vmem:[#allocation2 + $0x50] sm:$0xff]  ;;  %v38_v16 = vld [vmem:[#allocation2 + $0x40] sm:$0xff] }
   0xa   :  { %456 = vmatpush.msra.mxu1 %v49_v1  ;;  %425 = vmatmul.msk.f32.vlgmr.msra.gmra.mxu3 %vm51_vm0, %v42_v6  ;;  %v36_v13 = vld [vmem:[#allocation2 + $0x30] sm:$0xff]  ;;  %v45_v14 = vld [vmem:[#allocation2 + $0x78] sm:$0xff]  ;;  %v39_v17 = vld [vmem:[#allocation2 + $0x48] sm:$0xff] }
   0xb   :  { %424 = vmatmul.msk.f32.vlgmr.msra.gmra.mxu2 %vm51_vm0, %v41_v11  ;;  %423 = vmatmul.msk.f32.vlgmr.msra.gmra.mxu1 %vm51_vm0, %v40_v12  ;;  %v37_v15 = vld [vmem:[#allocation2 + $0x38] sm:$0xff]  ;;  %v46_v21 = vld [vmem:[%s666_s1] sm:$0xff]  ;;  %v47_v23 = vld [vmem:[%s666_s1 + $0x8] sm:$0xff] }
   0xc   :  { %v48_v25 = vld [vmem:[%s666_s1 + $0x10] sm:$0xf] }
  0x11   :  { %414 = vmatmul.msk.f32.gmra.mxu0 %vm51_vm0, %v31_v3 }
  0x12   :  { %426 = vmatmul.msk.f32.gmra.mxu3 %vm51_vm0, %v43_v8 }
  0x19   :  { %415 = vmatmul.msk.f32.gmra.mxu0 %vm51_vm0, %v32_v4 }
  0x1a   :  { %427 = vmatmul.msk.f32.gmra.mxu3 %vm51_vm0, %v44_v10 }
  0x21   :  { %416 = vmatmul.msk.f32.gmra.mxu0 %vm51_vm0, %v33_v5 }
  0x22   :  { %428 = vmatmul.msk.f32.gmra.mxu3 %vm51_vm0, %v45_v14 }
  0x29   :  { %417 = vmatmul.msk.f32.gmra.mxu0 %vm51_vm0, %v34_v7 }
  0x31   :  { %418 = vmatmul.msk.f32.gmra.mxu0 %vm51_vm0, %v35_v9 }
  0x39   :  { %419 = vmatmul.msk.f32.gmra.mxu0 %vm51_vm0, %v36_v13 }
  0x41   :  { %420 = vmatmul.msk.f32.gmra.mxu0 %vm51_vm0, %v37_v15 }
  0x49   :  { %421 = vmatmul.msk.f32.gmra.mxu0 %vm51_vm0, %v38_v16 }
  0x51   :  { %422 = vmatmul.msk.f32.gmra.mxu0 %vm51_vm0, %v39_v17 }
  0x86   :  { %v117_v18 = vpop.f32.mrf.mxu0 }
  0x88   :  { %v147_v31 = vpop.f32.mrf.mxu1 }
  0x8d   :  { %v153_v27 = vpop.f32.mrf.mxu3 }
  0x8e   :  { %v120_v19 = vpop.f32.mrf.mxu0  ;;  %v150_v28 = vpop.f32.mrf.mxu2 }
  0x8f   :  { %188 = vmatpush.msrb.mxu1 %v120_v19 }
  0x91   :  { %189 = vmatpush.msrb.mxu1 %v117_v18 }
  0x92   :  { %429 = vmatmul.msk.f32.vlgmr.msrb.gmra.mxu1 %vm51_vm0, %v46_v21 }
  0x95   :  { %v156_v30 = vpop.f32.mrf.mxu3 }
  0x96   :  { %v123_v20 = vpop.f32.mrf.mxu0 }
  0x9a   :  { %430 = vmatmul.msk.f32.gmra.mxu1 %vm51_vm0, %v47_v23 }
  0x9d   :  { %v159_v33 = vpop.f32.mrf.mxu3 }
  0x9e   :  { %v126_v22 = vpop.f32.mrf.mxu0 }
  0x9f   :  { %214 = vmatpush.msrb.mxu2 %v126_v22 }
  0xa1   :  { %215 = vmatpush.msrb.mxu2 %v123_v20 }
  0xa2   :  { %432 = vmatmul.msk.f32.vlgmr.msrb.gmra.mxu2 %vm51_vm0, %v46_v21  ;;  %431 = vmatmul.msk.f32.gmra.mxu1 %vm51_vm0, %v48_v25 }
  0xa5   :  { %v162_v36 = vpop.f32.mrf.mxu3 }
  0xa6   :  { %v129_v24 = vpop.f32.mrf.mxu0 }
  0xaa   :  { %433 = vmatmul.msk.f32.gmra.mxu2 %vm51_vm0, %v47_v23 }
  0xae   :  { %v132_v26 = vpop.f32.mrf.mxu0 }
  0xaf   :  { %240 = vmatpush.msrb.mxu3 %v132_v26 }
  0xb1   :  { %241 = vmatpush.msrb.mxu3 %v129_v24 }
  0xb2   :  { %434 = vmatmul.msk.f32.gmra.mxu2 %vm51_vm0, %v48_v25  ;;  %435 = vmatmul.msk.f32.vlgmr.msrb.gmra.mxu3 %vm51_vm0, %v46_v21 }
  0xb3   :  { %318 = vmatpush.msra.mxu3 %v150_v28 }
  0xb5   :  { %319 = vmatpush.msra.mxu3 %v147_v31 }
  0xb6   :  { %v135_v29 = vpop.f32.mrf.mxu0 }
  0xba   :  { %436 = vmatmul.msk.f32.gmra.mxu3 %vm51_vm0, %v47_v23 }
  0xbe   :  { %v138_v32 = vpop.f32.mrf.mxu0 }
  0xbf   :  { %266 = vmatpush.msra.mxu1 %v138_v32 }
  0xc1   :  { %267 = vmatpush.msra.mxu1 %v135_v29 }
  0xc2   :  { %437 = vmatmul.msk.f32.gmra.mxu3 %vm51_vm0, %v48_v25  ;;  %438 = vmatmul.msk.f32.vlgmr.msra.gmra.mxu1 %vm51_vm0, %v46_v21 }
  0xc3   :  { %344 = vmatpush.msrb.mxu1 %v156_v30 }
  0xc5   :  { %345 = vmatpush.msrb.mxu1 %v153_v27 }
  0xc6   :  { %v141_v34 = vpop.f32.mrf.mxu0 }
  0xca   :  { %444 = vmatmul.msk.f32.vlgmr.msra.gmra.mxu3 %vm51_vm0, %v46_v21  ;;  %439 = vmatmul.msk.f32.gmra.mxu1 %vm51_vm0, %v47_v23 }
  0xce   :  { %v144_v35 = vpop.f32.mrf.mxu0 }
  0xcf   :  { %292 = vmatpush.msra.mxu2 %v144_v35 }
  0xd1   :  { %293 = vmatpush.msra.mxu2 %v141_v34 }
  0xd2   :  { %445 = vmatmul.msk.f32.gmra.mxu3 %vm51_vm0, %v47_v23  ;;  %441 = vmatmul.msk.f32.vlgmr.msra.gmra.mxu2 %vm51_vm0, %v46_v21 }
  0xd3   :  { %370 = vmatpush.msrb.mxu2 %v162_v36  ;;  %440 = vmatmul.msk.f32.gmra.mxu1 %vm51_vm0, %v48_v25 }
  0xd5   :  { %371 = vmatpush.msrb.mxu2 %v159_v33 }
  0xda   :  { %446 = vmatmul.msk.f32.gmra.mxu3 %vm51_vm0, %v48_v25  ;;  %442 = vmatmul.msk.f32.gmra.mxu2 %vm51_vm0, %v47_v23 }
  0xdb   :  { %447 = vmatmul.msk.f32.vlgmr.msrb.gmra.mxu1 %vm51_vm0, %v46_v21 }
  0xe2   :  { %443 = vmatmul.msk.f32.gmra.mxu2 %vm51_vm0, %v48_v25 }
  0xe3   :  { %448 = vmatmul.msk.f32.gmra.mxu1 %vm51_vm0, %v47_v23 }
  0xea   :  { %450 = vmatmul.msk.f32.vlgmr.msrb.gmra.mxu2 %vm51_vm0, %v46_v21 }
  0xeb   :  { %449 = vmatmul.msk.f32.gmra.mxu1 %vm51_vm0, %v48_v25 }
  0xf2   :  { %451 = vmatmul.msk.f32.gmra.mxu2 %vm51_vm0, %v47_v23 }
  0xfa   :  { %452 = vmatmul.msk.f32.gmra.mxu2 %vm51_vm0, %v48_v25 }
 0x10f   :  { %v191_v37 = vpop.f32.mrf.mxu1 }
 0x110   :  { %383 = vst.msk [vmem:[%s668_s3] sm:$0xff] %vm382_vm1, %v191_v37 }
 0x117   :  { %v194_v38 = vpop.f32.mrf.mxu1 }
 0x118   :  { %384 = vst.msk [vmem:[%s668_s3 + $0x8] sm:$0xff] %vm382_vm1, %v194_v38 }
 0x11f   :  { %v197_v40 = vpop.f32.mrf.mxu1 }
 0x120   :  { %386 = vst.msk [vmem:[%s668_s3 + $0x10] sm:$0xf] %vm385_vm2, %v197_v40 }
 0x125   :  { %v217_v39 = vpop.f32.mrf.mxu2 }
 0x126   :  { %387 = vst.msk [vmem:[%s668_s3 + $0x18] sm:$0xff] %vm382_vm1, %v217_v39 }
 0x12d   :  { %v220_v41 = vpop.f32.mrf.mxu2 }
 0x12e   :  { %388 = vst.msk [vmem:[%s668_s3 + $0x20] sm:$0xff] %vm382_vm1, %v220_v41 }
 0x135   :  { %v223_v42 = vpop.f32.mrf.mxu2  ;;  %v243_v43 = vpop.f32.mrf.mxu3 }
 0x136   :  { %389 = vst.msk [vmem:[%s668_s3 + $0x28] sm:$0xf] %vm385_vm2, %v223_v42 }
 0x137   :  { %390 = vst.msk [vmem:[%s668_s3 + $0x30] sm:$0xff] %vm382_vm1, %v243_v43 }
 0x13d   :  { %v246_v44 = vpop.f32.mrf.mxu3 }
 0x13e   :  { %391 = vst.msk [vmem:[%s668_s3 + $0x38] sm:$0xff] %vm382_vm1, %v246_v44 }
 0x13f   :  { %v269_v45 = vpop.f32.mrf.mxu1 }
 0x140   :  { %393 = vst.msk [vmem:[%s668_s3 + $0x48] sm:$0xff] %vm382_vm1, %v269_v45 }
 0x145   :  { %v249_v46 = vpop.f32.mrf.mxu3 }
 0x146   :  { %392 = vst.msk [vmem:[%s668_s3 + $0x40] sm:$0xf] %vm385_vm2, %v249_v46 }
 0x147   :  { %v272_v47 = vpop.f32.mrf.mxu1 }
 0x148   :  { %394 = vst.msk [vmem:[%s668_s3 + $0x50] sm:$0xff] %vm382_vm1, %v272_v47 }
 0x14d   :  { %v321_v48 = vpop.f32.mrf.mxu3 }
 0x14e   :  { %399 = vst.msk [vmem:[%s668_s3 + $0x78] sm:$0xff] %vm382_vm1, %v321_v48 }
 0x150   :  { %v275_v49 = vpop.f32.mrf.mxu1 }
 0x151   :  { %395 = vst.msk [vmem:[%s668_s3 + $0x58] sm:$0xf] %vm385_vm2, %v275_v49 }
 0x155   :  { %v324_v50 = vpop.f32.mrf.mxu3  ;;  %v295_v51 = vpop.f32.mrf.mxu2 }
 0x156   :  { %400 = vst.msk [vmem:[%s668_s3 + $0x80] sm:$0xff] %vm382_vm1, %v324_v50 }
 0x157   :  { %396 = vst.msk [vmem:[%s668_s3 + $0x60] sm:$0xff] %vm382_vm1, %v295_v51 }
 0x158   :  { %v347_v52 = vpop.f32.mrf.mxu1 }
 0x159   :  { %402 = vst.msk [vmem:[%s668_s3 + $0x90] sm:$0xff] %vm382_vm1, %v347_v52 }
 0x15d   :  { %v327_v53 = vpop.f32.mrf.mxu3  ;;  %v298_v54 = vpop.f32.mrf.mxu2 }
 0x15e   :  { %401 = vst.msk [vmem:[%s668_s3 + $0x88] sm:$0xf] %vm385_vm2, %v327_v53 }
 0x15f   :  { %397 = vst.msk [vmem:[%s668_s3 + $0x68] sm:$0xff] %vm382_vm1, %v298_v54 }
 0x160   :  { %v350_v55 = vpop.f32.mrf.mxu1 }
 0x161   :  { %403 = vst.msk [vmem:[%s668_s3 + $0x98] sm:$0xff] %vm382_vm1, %v350_v55 }
 0x165   :  { %v301_v56 = vpop.f32.mrf.mxu2 }
 0x166   :  { %398 = vst.msk [vmem:[%s668_s3 + $0x70] sm:$0xf] %vm385_vm2, %v301_v56 }
 0x168   :  { %v353_v57 = vpop.f32.mrf.mxu1 }
 0x169   :  { %404 = vst.msk [vmem:[%s668_s3 + $0xa0] sm:$0xf] %vm385_vm2, %v353_v57 }
 0x16d   :  { %v373_v58 = vpop.f32.mrf.mxu2 }
 0x16e   :  { %405 = vst.msk [vmem:[%s668_s3 + $0xa8] sm:$0xff] %vm382_vm1, %v373_v58 }
 0x175   :  { %v376_v59 = vpop.f32.mrf.mxu2 }
 0x176   :  { %406 = vst.msk [vmem:[%s668_s3 + $0xb0] sm:$0xff] %vm382_vm1, %v376_v59 }
 0x17d   :  { %v379_v60 = vpop.f32.mrf.mxu2 }
 0x17e   :  { %407 = vst.msk [vmem:[%s668_s3 + $0xb8] sm:$0xf] %vm385_vm2, %v379_v60 }
 0x17f   :  { %412 = vsyncpa [#allocation3], 1 }

</bundles_post_ra>
